<compile_context>
chip_gen: v5e
topology: v5e:2x2
jax: 0.10.0
libtpu: 0.0.40
codegen_flags: <defaults>
</compile_context>

<pallas_src>
import functools

import jax
import jax.numpy as jnp
import numpy as np
from jax.experimental import pallas as pl
from jax.experimental.pallas import tpu as pltpu


# --------------------------- static pooling matrices ---------------------------
def _adaptive_pool_matrix(in_size, out_size):
    """(out_size, in_size) matrix implementing torch.nn.AdaptiveAvgPool1d bins."""
    m = np.zeros((out_size, in_size), np.float32)
    for i in range(out_size):
        s = (i * in_size) // out_size
        e = -((-(i + 1) * in_size) // out_size)      # ceil((i+1)*in/out)
        m[i, s:e] = 1.0 / (e - s)
    return m


def _pool_matrix_T(H, W, G):
    """(H*W, G*G) matrix:  pooled[c, gh*G+gw] = (x[c].reshape(H*W) @ this)[gh*G+gw]."""
    ah = _adaptive_pool_matrix(H, G)                  # (G, H)
    aw = _adaptive_pool_matrix(W, G)                  # (G, W)
    p = np.einsum("gh,fw->gfhw", ah, aw).reshape(G * G, H * W)
    return np.ascontiguousarray(p.T).astype(np.float32)


# ----------------------------------- kernel ------------------------------------
def _densecl_neck_kernel(x_ref, avg_ref, pt_ref,
                         w1_ref, b1_ref, w2_ref, b2_ref,
                         w3_ref, b3_ref, w4_ref, b4_ref,
                         ap_ref, dense_ref, ap2_ref):
    xf = x_ref[0]                                                          # (C, H*W) f32

    # ---- global branch: AdaptiveAvgPool2d((1,1)) -> Linear -> ReLU -> Linear
    gp = jnp.dot(xf, avg_ref[...], preferred_element_type=jnp.float32)     # (C, 1)
    h = jnp.dot(w1_ref[...], gp.astype(w1_ref.dtype),
                preferred_element_type=jnp.float32) + b1_ref[...]          # (hid, 1)
    h = jnp.maximum(h, 0.0)
    ap = jnp.dot(w2_ref[...], h.astype(w2_ref.dtype),
                 preferred_element_type=jnp.float32) + b2_ref[...]         # (out, 1)
    ap_ref[0] = ap

    # ---- dense branch: AdaptiveAvgPool2d((G,G)) -> Conv1x1 -> ReLU -> Conv1x1
    pooled = jnp.dot(xf, pt_ref[...], preferred_element_type=jnp.float32)  # (C, G*G)
    z = jnp.dot(w3_ref[...], pooled.astype(w3_ref.dtype),
                preferred_element_type=jnp.float32) + b3_ref[...]          # (hid, G*G)
    z = jnp.maximum(z, 0.0)
    y = jnp.dot(w4_ref[...], z.astype(w4_ref.dtype),
                preferred_element_type=jnp.float32) + b4_ref[...]          # (out, G*G)
    dense_ref[0] = y

    # ---- avgpool2 over the G*G grid positions
    ap2_ref[0] = jnp.mean(y, axis=-1, keepdims=True)                       # (out, 1)


# --------------------------------- call wrapper ---------------------------------
def _full_block_spec(shape):
    zeros = (0,) * len(shape)
    return pl.BlockSpec(shape, lambda n, _z=zeros: _z)


@functools.partial(jax.jit, static_argnames=("num_grid",))
def densecl_neck_forward(x_nchw, params, num_grid=7):
    """Returns (avgpooled_x (N,out), dense (N,out,G*G), avgpooled_x2 (N,out))."""
    N, C, H, W = x_nchw.shape
    G = int(num_grid)
    GG = G * G
    hid = params["b1"].shape[0]
    out_c = params["b2"].shape[0]

    # TODO(synk): with_pool=False (num_grid=None) branch is not implemented;
    # the default DenseCLNeck configuration (num_grid=7) is supported.

    pt = jnp.asarray(_pool_matrix_T(H, W, G))                       # (H*W, G*G) f32
    avg_col = jnp.full((H * W, 1), 1.0 / (H * W), jnp.float32)      # global-avg column

    # Pure metadata reshape (NCHW kept, no transpose): per-sample (C, H*W) tiles.
    x2 = x_nchw.astype(jnp.float32).reshape(N, C, H * W)

    full = _full_block_spec
    ap, dense, ap2 = pl.pallas_call(
        _densecl_neck_kernel,
        grid=(N,),
        in_specs=(
            pl.BlockSpec((1, C, H * W), lambda n: (n, 0, 0)),   # x (per-sample tile)
            full((H * W, 1)),                                   # global-avg pooling column
            full((H * W, GG)),                                  # adaptive-pool matrix
            full((hid, C)), full((hid, 1)),                     # mlp Linear(in->hid)
            full((out_c, hid)), full((out_c, 1)),               # mlp Linear(hid->out)
            full((hid, C)), full((hid, 1)),                     # mlp2 Conv1x1(in->hid)
            full((out_c, hid)), full((out_c, 1)),               # mlp2 Conv1x1(hid->out)
        ),
        out_specs=(
            pl.BlockSpec((1, out_c, 1), lambda n: (n, 0, 0)),
            pl.BlockSpec((1, out_c, GG), lambda n: (n, 0, 0)),
            pl.BlockSpec((1, out_c, 1), lambda n: (n, 0, 0)),
        ),
        out_shape=(
            jax.ShapeDtypeStruct((N, out_c, 1), jnp.float32),
            jax.ShapeDtypeStruct((N, out_c, GG), jnp.float32),
            jax.ShapeDtypeStruct((N, out_c, 1), jnp.float32),
        ),
        compiler_params=pltpu.CompilerParams(
            dimension_semantics=("parallel",),
            vmem_limit_bytes=32 * 1024 * 1024,
        ),
    )(
        x2, avg_col, pt,
        params["w1"], params["b1"], params["w2"], params["b2"],
        params["w3"], params["b3"], params["w4"], params["b4"],
    )

    return ap.reshape(N, out_c), dense, ap2.reshape(N, out_c)


# ------------------------------ parameter setup ---------------------------------
def init_params(key, in_channels, hid_channels, out_channels):
    """Deterministic params in PyTorch layout: Linear/Conv1x1 weight = (out, in)."""
    ks = jax.random.split(key, 8)

    def w(k, o, i):
        return 0.1 * jax.random.normal(k, (o, i), jnp.float32)

    def b(k, o):
        return 0.1 * jax.random.normal(k, (o,), jnp.float32)

    return dict(
        w1=w(ks[0], hid_channels, in_channels).astype(jnp.bfloat16),   # mlp[0].weight
        b1=b(ks[1], hid_channels).reshape(hid_channels, 1),            # mlp[0].bias
        w2=w(ks[2], out_channels, hid_channels).astype(jnp.bfloat16),  # mlp[2].weight
        b2=b(ks[3], out_channels).reshape(out_channels, 1),            # mlp[2].bias
        w3=w(ks[4], hid_channels, in_channels).astype(jnp.bfloat16),   # mlp2[0].weight (1x1)
        b3=b(ks[5], hid_channels).reshape(hid_channels, 1),            # mlp2[0].bias
        w4=w(ks[6], out_channels, hid_channels).astype(jnp.bfloat16),  # mlp2[2].weight (1x1)
        b4=b(ks[7], out_channels).reshape(out_channels, 1),            # mlp2[2].bias
    )


# ------------------------------ pure-JAX reference -------------------------------
def densecl_neck_reference(x_nchw, params, num_grid=7):
    """Pure-JAX reference of the PyTorch forward (same bf16 weights, f32 pooling)."""
    N, C, H, W = x_nchw.shape
    G = int(num_grid)
    x = x_nchw.astype(jnp.float32)
    w1, b1 = params["w1"], params["b1"]
    w2, b2 = params["w2"], params["b2"]
    w3, b3 = params["w3"], params["b3"]
    w4, b4 = params["w4"], params["b4"]

    # avgpool(1,1) + mlp
    gp = jnp.mean(x, axis=(2, 3))                                           # (N, C)
    h = jnp.maximum(jnp.dot(gp.astype(w1.dtype), w1.T,
                            preferred_element_type=jnp.float32) + b1.T, 0.0)
    ap = jnp.dot(h.astype(w2.dtype), w2.T,
                 preferred_element_type=jnp.float32) + b2.T                 # (N, out)

    # adaptive avgpool(G,G) + mlp2
    ah = jnp.asarray(_adaptive_pool_matrix(H, G))
    aw = jnp.asarray(_adaptive_pool_matrix(W, G))
    pooled = jnp.einsum("gh,fw,nchw->ncgf", ah, aw, x).reshape(N, C, G * G)
    z = jnp.maximum(
        jnp.einsum("oc,ncg->nog", w3, pooled.astype(w3.dtype),
                   preferred_element_type=jnp.float32) + b3[None], 0.0)
    y = jnp.einsum("oc,ncg->nog", w4, z.astype(w4.dtype),
                   preferred_element_type=jnp.float32) + b4[None]           # (N, out, G*G)
    ap2 = jnp.mean(y, axis=-1)                                              # (N, out)
    return ap, y, ap2


# ------------------------------------- main --------------------------------------
if __name__ == "__main__":
    key = jax.random.PRNGKey(0)
    kx, kp = jax.random.split(key)

    N, C, H, W = 2, 64, 16, 16         # in_channels=64
    HID, OUT, G = 32, 32, 7            # hid_channels=32, out_channels=32, num_grid=7

    x = jax.random.normal(kx, (N, C, H, W), jnp.float32)   # NCHW, like PyTorch
    params = init_params(kp, C, HID, OUT)

    ap, dense, ap2 = jax.block_until_ready(densecl_neck_forward(x, params, num_grid=G))

    assert ap.shape == (N, OUT)
    assert dense.shape == (N, OUT, G * G)
    assert ap2.shape == (N, OUT)

    r_ap, r_dense, r_ap2 = jax.block_until_ready(densecl_neck_reference(x, params, G))
    np.testing.assert_allclose(np.asarray(ap), np.asarray(r_ap), atol=1e-2, rtol=1e-2)
    np.testing.assert_allclose(np.asarray(dense), np.asarray(r_dense), atol=1e-2, rtol=1e-2)
    np.testing.assert_allclose(np.asarray(ap2), np.asarray(r_ap2), atol=1e-2, rtol=1e-2)

    print("KERNEL_OK")
</pallas_src>

<mosaic_0001>
module attributes {stable_mosaic.version = 11 : i64} {
  func.func @_densecl_neck_kernel(%arg0: i32, %arg1: memref<1x64x256xf32, #tpu.memory_space<vmem>>, %arg2: memref<256x1xf32, #tpu.memory_space<vmem>>, %arg3: memref<256x49xf32, #tpu.memory_space<vmem>>, %arg4: memref<32x64xbf16, #tpu.memory_space<vmem>>, %arg5: memref<32x1xf32, #tpu.memory_space<vmem>>, %arg6: memref<32x32xbf16, #tpu.memory_space<vmem>>, %arg7: memref<32x1xf32, #tpu.memory_space<vmem>>, %arg8: memref<32x64xbf16, #tpu.memory_space<vmem>>, %arg9: memref<32x1xf32, #tpu.memory_space<vmem>>, %arg10: memref<32x32xbf16, #tpu.memory_space<vmem>>, %arg11: memref<32x1xf32, #tpu.memory_space<vmem>>, %arg12: memref<1x32x1xf32, #tpu.memory_space<vmem>>, %arg13: memref<1x32x49xf32, #tpu.memory_space<vmem>>, %arg14: memref<1x32x1xf32, #tpu.memory_space<vmem>>) attributes {dimension_semantics = [#tpu.dimension_semantics<parallel>], iteration_bounds = array<i64: 2>, scalar_prefetch = 0 : i64, scratch_operands = 0 : i64, tpu.core_type = #tpu.core_type<tc>, window_params = [{transform_indices = @transform_0, window_bounds = array<i64: 1, 64, 256>}, {pipeline_mode = #tpu.pipeline_mode<synchronous>, transform_indices = @transform_1, window_bounds = array<i64: 256, 1>}, {pipeline_mode = #tpu.pipeline_mode<synchronous>, transform_indices = @transform_2, window_bounds = array<i64: 256, 49>}, {pipeline_mode = #tpu.pipeline_mode<synchronous>, transform_indices = @transform_3, window_bounds = array<i64: 32, 64>}, {pipeline_mode = #tpu.pipeline_mode<synchronous>, transform_indices = @transform_4, window_bounds = array<i64: 32, 1>}, {pipeline_mode = #tpu.pipeline_mode<synchronous>, transform_indices = @transform_5, window_bounds = array<i64: 32, 32>}, {pipeline_mode = #tpu.pipeline_mode<synchronous>, transform_indices = @transform_6, window_bounds = array<i64: 32, 1>}, {pipeline_mode = #tpu.pipeline_mode<synchronous>, transform_indices = @transform_7, window_bounds = array<i64: 32, 64>}, {pipeline_mode = #tpu.pipeline_mode<synchronous>, transform_indices = @transform_8, window_bounds = array<i64: 32, 1>}, {pipeline_mode = #tpu.pipeline_mode<synchronous>, transform_indices = @transform_9, window_bounds = array<i64: 32, 32>}, {pipeline_mode = #tpu.pipeline_mode<synchronous>, transform_indices = @transform_10, window_bounds = array<i64: 32, 1>}, {transform_indices = @transform_11, window_bounds = array<i64: 1, 32, 1>}, {transform_indices = @transform_12, window_bounds = array<i64: 1, 32, 49>}, {transform_indices = @transform_13, window_bounds = array<i64: 1, 32, 1>}]} {
    %c0 = arith.constant 0 : index
    %c0_0 = arith.constant 0 : index
    %c0_1 = arith.constant 0 : index
    %0 = vector.load %arg1[%c0, %c0_0, %c0_1] : memref<1x64x256xf32, #tpu.memory_space<vmem>>, vector<1x64x256xf32>
    %1 = vector.shape_cast %0 : vector<1x64x256xf32> to vector<64x256xf32>
    %c0_2 = arith.constant 0 : index
    %c0_3 = arith.constant 0 : index
    %2 = vector.load %arg2[%c0_2, %c0_3] : memref<256x1xf32, #tpu.memory_space<vmem>>, vector<256x1xf32>
    %cst = arith.constant dense<0.000000e+00> : vector<64x1xf32>
    %3 = tpu.matmul %1, %2, %cst {dimension_numbers = #tpu.dot_dimension_numbers<[1], [0], [0], [1], [0, 0, 1, 1], [], []>} : vector<64x256xf32>, vector<256x1xf32>, vector<64x1xf32> -> vector<64x1xf32>
    %c0_4 = arith.constant 0 : index
    %c0_5 = arith.constant 0 : index
    %4 = vector.load %arg4[%c0_4, %c0_5] : memref<32x64xbf16, #tpu.memory_space<vmem>>, vector<32x64xbf16>
    %5 = arith.truncf %3 : vector<64x1xf32> to vector<64x1xbf16>
    %cst_6 = arith.constant dense<0.000000e+00> : vector<32x1xf32>
    %6 = tpu.matmul %4, %5, %cst_6 {dimension_numbers = #tpu.dot_dimension_numbers<[1], [0], [0], [1], [0, 0, 1, 1], [], []>} : vector<32x64xbf16>, vector<64x1xbf16>, vector<32x1xf32> -> vector<32x1xf32>
    %c0_7 = arith.constant 0 : index
    %c0_8 = arith.constant 0 : index
    %7 = vector.load %arg5[%c0_7, %c0_8] : memref<32x1xf32, #tpu.memory_space<vmem>>, vector<32x1xf32>
    %8 = arith.addf %6, %7 : vector<32x1xf32>
    %cst_9 = arith.constant 0.000000e+00 : f32
    %9 = vector.broadcast %cst_9 : f32 to vector<32x1xf32>
    %10 = arith.maximumf %8, %9 : vector<32x1xf32>
    %c0_10 = arith.constant 0 : index
    %c0_11 = arith.constant 0 : index
    %11 = vector.load %arg6[%c0_10, %c0_11] : memref<32x32xbf16, #tpu.memory_space<vmem>>, vector<32x32xbf16>
    %12 = arith.truncf %10 : vector<32x1xf32> to vector<32x1xbf16>
    %cst_12 = arith.constant dense<0.000000e+00> : vector<32x1xf32>
    %13 = tpu.matmul %11, %12, %cst_12 {dimension_numbers = #tpu.dot_dimension_numbers<[1], [0], [0], [1], [0, 0, 1, 1], [], []>} : vector<32x32xbf16>, vector<32x1xbf16>, vector<32x1xf32> -> vector<32x1xf32>
    %c0_13 = arith.constant 0 : index
    %c0_14 = arith.constant 0 : index
    %14 = vector.load %arg7[%c0_13, %c0_14] : memref<32x1xf32, #tpu.memory_space<vmem>>, vector<32x1xf32>
    %15 = arith.addf %13, %14 : vector<32x1xf32>
    %c0_15 = arith.constant 0 : index
    %c0_16 = arith.constant 0 : index
    %c0_17 = arith.constant 0 : index
    %16 = vector.load %arg12[%c0_15, %c0_16, %c0_17] : memref<1x32x1xf32, #tpu.memory_space<vmem>>, vector<1x32x1xf32>
    %17 = vector.shape_cast %16 : vector<1x32x1xf32> to vector<32x1xf32>
    %18 = vector.shape_cast %15 : vector<32x1xf32> to vector<1x32x1xf32>
    tpu.vector_store %arg12[%c0_15, %c0_16, %c0_17], %18 {strides = array<i32>} : memref<1x32x1xf32, #tpu.memory_space<vmem>>, vector<1x32x1xf32>,
    %c0_18 = arith.constant 0 : index
    %c0_19 = arith.constant 0 : index
    %19 = vector.load %arg3[%c0_18, %c0_19] : memref<256x49xf32, #tpu.memory_space<vmem>>, vector<256x49xf32>
    %cst_20 = arith.constant dense<0.000000e+00> : vector<64x49xf32>
    %20 = tpu.matmul %1, %19, %cst_20 {dimension_numbers = #tpu.dot_dimension_numbers<[1], [0], [0], [1], [0, 0, 1, 1], [], []>} : vector<64x256xf32>, vector<256x49xf32>, vector<64x49xf32> -> vector<64x49xf32>
    %c0_21 = arith.constant 0 : index
    %c0_22 = arith.constant 0 : index
    %21 = vector.load %arg8[%c0_21, %c0_22] : memref<32x64xbf16, #tpu.memory_space<vmem>>, vector<32x64xbf16>
    %22 = arith.truncf %20 : vector<64x49xf32> to vector<64x49xbf16>
    %cst_23 = arith.constant dense<0.000000e+00> : vector<32x49xf32>
    %23 = tpu.matmul %21, %22, %cst_23 {dimension_numbers = #tpu.dot_dimension_numbers<[1], [0], [0], [1], [0, 0, 1, 1], [], []>} : vector<32x64xbf16>, vector<64x49xbf16>, vector<32x49xf32> -> vector<32x49xf32>
    %c0_24 = arith.constant 0 : index
    %c0_25 = arith.constant 0 : index
    %24 = vector.load %arg9[%c0_24, %c0_25] : memref<32x1xf32, #tpu.memory_space<vmem>>, vector<32x1xf32>
    %25 = vector.broadcast %24 : vector<32x1xf32> to vector<32x49xf32>
    %26 = arith.addf %23, %25 : vector<32x49xf32>
    %cst_26 = arith.constant 0.000000e+00 : f32
    %27 = vector.broadcast %cst_26 : f32 to vector<32x49xf32>
    %28 = arith.maximumf %26, %27 : vector<32x49xf32>
    %c0_27 = arith.constant 0 : index
    %c0_28 = arith.constant 0 : index
    %29 = vector.load %arg10[%c0_27, %c0_28] : memref<32x32xbf16, #tpu.memory_space<vmem>>, vector<32x32xbf16>
    %30 = arith.truncf %28 : vector<32x49xf32> to vector<32x49xbf16>
    %cst_29 = arith.constant dense<0.000000e+00> : vector<32x49xf32>
    %31 = tpu.matmul %29, %30, %cst_29 {dimension_numbers = #tpu.dot_dimension_numbers<[1], [0], [0], [1], [0, 0, 1, 1], [], []>} : vector<32x32xbf16>, vector<32x49xbf16>, vector<32x49xf32> -> vector<32x49xf32>
    %c0_30 = arith.constant 0 : index
    %c0_31 = arith.constant 0 : index
    %32 = vector.load %arg11[%c0_30, %c0_31] : memref<32x1xf32, #tpu.memory_space<vmem>>, vector<32x1xf32>
    %33 = vector.broadcast %32 : vector<32x1xf32> to vector<32x49xf32>
    %34 = arith.addf %31, %33 : vector<32x49xf32>
    %c0_32 = arith.constant 0 : index
    %c0_33 = arith.constant 0 : index
    %c0_34 = arith.constant 0 : index
    %35 = vector.load %arg13[%c0_32, %c0_33, %c0_34] : memref<1x32x49xf32, #tpu.memory_space<vmem>>, vector<1x32x49xf32>
    %36 = vector.shape_cast %35 : vector<1x32x49xf32> to vector<32x49xf32>
    %37 = vector.shape_cast %34 : vector<32x49xf32> to vector<1x32x49xf32>
    tpu.vector_store %arg13[%c0_32, %c0_33, %c0_34], %37 {strides = array<i32>} : memref<1x32x49xf32, #tpu.memory_space<vmem>>, vector<1x32x49xf32>,
    %cst_35 = arith.constant dense<0.000000e+00> : vector<32xf32>
    %38 = vector.multi_reduction <add>, %34, %cst_35 [1] : vector<32x49xf32> to vector<32xf32>
    %39 = vector.shape_cast %38 : vector<32xf32> to vector<32x1xf32>
    %cst_36 = arith.constant 4.900000e+01 : f32
    %40 = vector.broadcast %cst_36 : f32 to vector<32x1xf32>
    %41 = arith.divf %39, %40 : vector<32x1xf32>
    %c0_37 = arith.constant 0 : index
    %c0_38 = arith.constant 0 : index
    %c0_39 = arith.constant 0 : index
    %42 = vector.load %arg14[%c0_37, %c0_38, %c0_39] : memref<1x32x1xf32, #tpu.memory_space<vmem>>, vector<1x32x1xf32>
    %43 = vector.shape_cast %42 : vector<1x32x1xf32> to vector<32x1xf32>
    %44 = vector.shape_cast %41 : vector<32x1xf32> to vector<1x32x1xf32>
    tpu.vector_store %arg14[%c0_37, %c0_38, %c0_39], %44 {strides = array<i32>} : memref<1x32x1xf32, #tpu.memory_space<vmem>>, vector<1x32x1xf32>,
    return
  }
  func.func @transform_0(%arg0: i32) -> (i32, i32, i32) {
    %c0_i32 = arith.constant 0 : i32
    %c0_i32_0 = arith.constant 0 : i32
    %c0_i32_1 = arith.constant 0 : i32
    return %arg0, %c0_i32, %c0_i32_0 : i32, i32, i32
  }
  func.func @transform_1(%arg0: i32) -> (i32, i32) {
    %c0_i32 = arith.constant 0 : i32
    %c0_i32_0 = arith.constant 0 : i32
    %c0_i32_1 = arith.constant 0 : i32
    return %c0_i32, %c0_i32_0 : i32, i32
  }
  func.func @transform_2(%arg0: i32) -> (i32, i32) {
    %c0_i32 = arith.constant 0 : i32
    %c0_i32_0 = arith.constant 0 : i32
    %c0_i32_1 = arith.constant 0 : i32
    return %c0_i32, %c0_i32_0 : i32, i32
  }
  func.func @transform_3(%arg0: i32) -> (i32, i32) {
    %c0_i32 = arith.constant 0 : i32
    %c0_i32_0 = arith.constant 0 : i32
    %c0_i32_1 = arith.constant 0 : i32
    return %c0_i32, %c0_i32_0 : i32, i32
  }
  func.func @transform_4(%arg0: i32) -> (i32, i32) {
    %c0_i32 = arith.constant 0 : i32
    %c0_i32_0 = arith.constant 0 : i32
    %c0_i32_1 = arith.constant 0 : i32
    return %c0_i32, %c0_i32_0 : i32, i32
  }
  func.func @transform_5(%arg0: i32) -> (i32, i32) {
    %c0_i32 = arith.constant 0 : i32
    %c0_i32_0 = arith.constant 0 : i32
    %c0_i32_1 = arith.constant 0 : i32
    return %c0_i32, %c0_i32_0 : i32, i32
  }
  func.func @transform_6(%arg0: i32) -> (i32, i32) {
    %c0_i32 = arith.constant 0 : i32
    %c0_i32_0 = arith.constant 0 : i32
    %c0_i32_1 = arith.constant 0 : i32
    return %c0_i32, %c0_i32_0 : i32, i32
  }
  func.func @transform_7(%arg0: i32) -> (i32, i32) {
    %c0_i32 = arith.constant 0 : i32
    %c0_i32_0 = arith.constant 0 : i32
    %c0_i32_1 = arith.constant 0 : i32
    return %c0_i32, %c0_i32_0 : i32, i32
  }
  func.func @transform_8(%arg0: i32) -> (i32, i32) {
    %c0_i32 = arith.constant 0 : i32
    %c0_i32_0 = arith.constant 0 : i32
    %c0_i32_1 = arith.constant 0 : i32
    return %c0_i32, %c0_i32_0 : i32, i32
  }
  func.func @transform_9(%arg0: i32) -> (i32, i32) {
    %c0_i32 = arith.constant 0 : i32
    %c0_i32_0 = arith.constant 0 : i32
    %c0_i32_1 = arith.constant 0 : i32
    return %c0_i32, %c0_i32_0 : i32, i32
  }
  func.func @transform_10(%arg0: i32) -> (i32, i32) {
    %c0_i32 = arith.constant 0 : i32
    %c0_i32_0 = arith.constant 0 : i32
    %c0_i32_1 = arith.constant 0 : i32
    return %c0_i32, %c0_i32_0 : i32, i32
  }
  func.func @transform_11(%arg0: i32) -> (i32, i32, i32) {
    %c0_i32 = arith.constant 0 : i32
    %c0_i32_0 = arith.constant 0 : i32
    %c0_i32_1 = arith.constant 0 : i32
    return %arg0, %c0_i32, %c0_i32_0 : i32, i32, i32
  }
  func.func @transform_12(%arg0: i32) -> (i32, i32, i32) {
    %c0_i32 = arith.constant 0 : i32
    %c0_i32_0 = arith.constant 0 : i32
    %c0_i32_1 = arith.constant 0 : i32
    return %arg0, %c0_i32, %c0_i32_0 : i32, i32, i32
  }
  func.func @transform_13(%arg0: i32) -> (i32, i32, i32) {
    %c0_i32 = arith.constant 0 : i32
    %c0_i32_0 = arith.constant 0 : i32
    %c0_i32_1 = arith.constant 0 : i32
    return %arg0, %c0_i32, %c0_i32_0 : i32, i32, i32
  }
}

</mosaic_0001>

<bundles_post_ra>
// kernel: densecl_neck_forward.1
= control target key start
LH: loop header
LB: loop body
LE: loop exit
PB: predicated region body
PF: predicated region fallthrough
CT: control target
= control target key end

     0   :  { %19 = vsyncpa [#allocation3], 0  ;;  %s1855_s0 = inlined_call_operand.vmem [shape: f32[2,64,256], index: 0, kind: input, shape index: {}]   ;;  %s1856_s1 = inlined_call_operand.vmem [shape: f32[256,1], index: 1, kind: input, shape index: {}]   ;;  %s1857_s2 = inlined_call_operand.vmem [shape: f32[256,49], index: 2, kind: input, shape index: {}]   ;;  %s1858_s3 = inlined_call_operand.vmem [shape: bf16[32,64], index: 3, kind: input, shape index: {}]   ;;  %s1859_s4 = inlined_call_operand.vmem [shape: f32[32,1], index: 4, kind: input, shape index: {}]   ;;  %s1860_s5 = inlined_call_operand.vmem [shape: bf16[32,32], index: 5, kind: input, shape index: {}]   ;;  %s1861_s6 = inlined_call_operand.vmem [shape: f32[32,1], index: 6, kind: input, shape index: {}]   ;;  %s1862_s7 = inlined_call_operand.vmem [shape: bf16[32,64], index: 7, kind: input, shape index: {}]   ;;  %s1863_s8 = inlined_call_operand.vmem [shape: f32[32,1], index: 8, kind: input, shape index: {}]   ;;  %s1864_s9 = inlined_call_operand.vmem [shape: bf16[32,32], index: 9, kind: input, shape index: {}]   ;;  %s1865_s10 = inlined_call_operand.vmem [shape: f32[32,1], index: 10, kind: input, shape index: {}]   ;;  %s1866_s11 = inlined_call_operand.vmem [shape: f32[2,32,1], index: 11, kind: output, shape index: {0}]   ;;  %s1867_s12 = inlined_call_operand.hbm [shape: f32[2,32,49], index: 12, kind: output, shape index: {1}]   ;;  %s1868_s13 = inlined_call_operand.vmem [shape: f32[2,32,1], index: 13, kind: output, shape index: {2}]  }
   0x1   :  { %21 = vsyncpa [#allocation3 + $0x1], 0  ;;  %s1382_s25 = smov 0   ;;  %s1384_s26 = smov 0  }
   0x2   :  { %s1386_s27 = smov 0   ;;  %s1388_s28 = smov 0  }
   0x3 LB: > { %1874 = sst [smem:[#allocation5_spill]] %s1294_s25  ;;  %s1403_s29 = sadd.s32 4294967295, %s1306_s28   ;;  %s1306_s28 = sphi %s1388_s28, %s1883_s28   ;;  %s1302_s27 = sphi %s1386_s27, %s1885_s27   ;;  %s1298_s26 = sphi %s1384_s26, %s1887_s26   ;;  %s1294_s25 = sphi %s1382_s25, %s1886_s25  }
   0x4   : > { %1875 = sst [smem:[#allocation6_spill]] %s1302_s27  ;;  %s1124_s30 = sadd.s32 4294967294, %s1306_s28  }
   0x5   : > { %s1407_s14 = sadd.s32 1, %s1306_s28   ;;  %s296_s15 = sadd.s32 1, %s1302_s27 }
   0x6   : > { %1876 = sst [smem:[#allocation7_spill]] %s1407_s14  ;;  %s293_s16 = ssub.s32 %s1306_s28, %s1407_s14 }
   0x7   : > { %p306_p0 = scmp.ne.s32.totalorder %s1302_s27, %s1298_s26  ;;  %p294_p1 = scmp.eq.s32.totalorder %s293_s16, 0 }
   0x8   : > { %p307_p2 = scmp.eq.s32.totalorder %s1403_s29, 1  ;;  %p312_p3 = scmp.ne.s32.totalorder %s1298_s26, %s1294_s25 }
   0x9   : > { %p313_p4 = scmp.eq.s32.totalorder %s1124_s30, 1  ;;  %p1127_p7 = scmp.ge.s32.totalorder %s1306_s28, 1 }
   0xa   : > { %s1418_s17 = scalar_select %p294_p1, %s1302_s27, %s296_s15  }
   0xb   : > { %p1420_p5 = por %p307_p2, %p306_p0  ;;  %p1424_p6 = por %p313_p4, %p312_p3 }
   0xc   : > { %1877 = sst [smem:[#allocation8_spill]] %s1418_s17  ;;  %p395_p8 = scmp.lt.s32.totalorder %s1306_s28, 3 }
   0xd   : > { %s1879_s19 = scalar_select %p1424_p6, 1, 0 }
   0xe   : > { %p396_p9 = pnand %p1127_p7, %p395_p8 }
   0xf   : > { %1880 = sst [smem:[#allocation9_spill]] %s1879_s19  ;;  %p449_p10 = scmp.lt.s32.totalorder (!%p396_p9), %s1403_s29, 1 }
  0x10   : > { %399 = sbr.rel (%p396_p9) target bundleno = 1088 (0x440), region = 64  ;;  %s439_s16 = sand.u32 (!%p396_p9), 1, %s1298_s26  }
  0x11   : > { %s1264_s27 = scalar_lea.hbm (!%p396_p9), %s1867_s12, 64 }
  0x15   : > { %v496_v0 = vld [vmem:[%s1856_s1 + $0x78] sm:$0xff]  ;;  %v495_v2 = vld [vmem:[%s1856_s1 + $0x70] sm:$0xff]  ;;  %v494_v4 = vld [vmem:[%s1856_s1 + $0x68] sm:$0xff]  ;;  %s1498_s24 = scalar_select %p449_p10, %s1403_s29, 1  ;;  %vm617_vm0 = vcmask 523264   ;;  %vm667_vm1 = vcmask 261120  }
  0x16   : > { %v512_v1 = vld [vmem:[%s1856_s1 + $0xf8] sm:$0xff]  ;;  %513 = vmatpush.msra.mxu0 %v496_v0  ;;  %v511_v3 = vld [vmem:[%s1856_s1 + $0xf0] sm:$0xff]  ;;  %v510_v5 = vld [vmem:[%s1856_s1 + $0xe8] sm:$0xff]  ;;  %vm693_vm2 = vcmask 7168   ;;  %vm948_vm3 = vcmask 400384  }
  0x17   : > { %554 = vmatpush.msra.mxu1 %v512_v1  ;;  %v493_v6 = vld [vmem:[%s1856_s1 + $0x60] sm:$0xff]  ;;  %v492_v8 = vld [vmem:[%s1856_s1 + $0x58] sm:$0xff]  ;;  %v491_v10 = vld [vmem:[%s1856_s1 + $0x50] sm:$0xff]  ;;  %s1180_s23 = sshll.u32 %s1498_s24, 7  ;;  %s1181_s14 = sshll.u32 %s1498_s24, 5 }
  0x18   : > { %514 = vmatpush.msra.mxu0 %v495_v2  ;;  %v509_v7 = vld [vmem:[%s1856_s1 + $0xe0] sm:$0xff]  ;;  %v508_v9 = vld [vmem:[%s1856_s1 + $0xd8] sm:$0xff]  ;;  %v507_v11 = vld [vmem:[%s1856_s1 + $0xd0] sm:$0xff]  ;;  %s1528_s25 = scalar_lea.vmem %s1855_s0, %s1180_s23  ;;  %s458_s19 = scalar_lea.vmem %s1866_s11, %s1181_s14 }
  0x19   : > { %555 = vmatpush.msra.mxu1 %v511_v3  ;;  %v490_v12 = vld [vmem:[%s1856_s1 + $0x48] sm:$0xff]  ;;  %v489_v14 = vld [vmem:[%s1856_s1 + $0x40] sm:$0xff]  ;;  %v488_v16 = vld [vmem:[%s1856_s1 + $0x38] sm:$0xff]  ;;  %s1191_s23 = sshll.u32 %s1403_s29, 5  ;;  %s986_s29 = scalar_lea.sflag [#allocation3], %s439_s16 }
  0x1a   : > { %515 = vmatpush.msra.mxu0 %v494_v4  ;;  %v506_v13 = vld [vmem:[%s1856_s1 + $0xc8] sm:$0xff]  ;;  %v505_v15 = vld [vmem:[%s1856_s1 + $0xc0] sm:$0xff]  ;;  %v504_v17 = vld [vmem:[%s1856_s1 + $0xb8] sm:$0xff]  ;;  %s1005_s20 = scalar_lea.hbm %s1867_s12, %s1191_s23 }
  0x1b   : > { %556 = vmatpush.msra.mxu1 %v510_v5  ;;  %v487_v18 = vld [vmem:[%s1856_s1 + $0x30] sm:$0xff]  ;;  %v486_v20 = vld [vmem:[%s1856_s1 + $0x28] sm:$0xff]  ;;  %v485_v22 = vld [vmem:[%s1856_s1 + $0x20] sm:$0xff]  ;;  %s1008_s22 = sshll.u32 %s1005_s20, 4  ;;  %s1009_s22 = int_to_ptr.hbm [resolvable:$true] %s1008_s22 }
  0x1c   : > { %516 = vmatpush.msra.mxu0 %v493_v6  ;;  %v503_v19 = vld [vmem:[%s1856_s1 + $0xb0] sm:$0xff]  ;;  %v502_v21 = vld [vmem:[%s1856_s1 + $0xa8] sm:$0xff]  ;;  %v501_v23 = vld [vmem:[%s1856_s1 + $0xa0] sm:$0xff]  ;;  %s1258_s30 = sshra.s32 %s1009_s22, 4  ;;  %s1259_s30 = int_to_ptr.hbm [resolvable:$true] %s1258_s30 }
  0x1d   : > { %557 = vmatpush.msra.mxu1 %v509_v7  ;;  %v484_v24 = vld [vmem:[%s1856_s1 + $0x18] sm:$0xff]  ;;  %v483_v26 = vld [vmem:[%s1856_s1 + $0x10] sm:$0xff]  ;;  %v482_v28 = vld [vmem:[%s1856_s1 + $0x8] sm:$0xff]  ;;  %s1260_s15 = scalar_lea.hbm %s1259_s30, 32  ;;  %p1265_p0 = scmp.lt.s32.totalorder %s1259_s30, %s1867_s12 }
  0x1e   : > { %517 = vmatpush.msra.mxu0 %v492_v8  ;;  %v500_v25 = vld [vmem:[%s1856_s1 + $0x98] sm:$0xff]  ;;  %v499_v27 = vld [vmem:[%s1856_s1 + $0x90] sm:$0xff]  ;;  %v498_v29 = vld [vmem:[%s1856_s1 + $0x88] sm:$0xff]  ;;  %p1261_p11 = scmp.ne.s32.totalorder %s1259_s30, %s1260_s15  ;;  %p1266_p1 = scmp.lt.s32.totalorder %s1264_s27, %s1260_s15 }
  0x1f   : > { %558 = vmatpush.msra.mxu1 %v508_v9  ;;  %v481_v30 = vld [vmem:[%s1856_s1] sm:$0xff]  ;;  %v1540_v33 = vld [vmem:[%s1528_s25 + $0x8] sm:$0xff]  ;;  %v1545_v34 = vld [vmem:[%s1528_s25 + $0x10] sm:$0xff] }
  0x20   : > { %518 = vmatpush.msra.mxu0 %v491_v10  ;;  %v497_v31 = vld [vmem:[%s1856_s1 + $0x80] sm:$0xff]  ;;  %v1548_v35 = vld [vmem:[%s1528_s25 + $0x18] sm:$0xff]  ;;  %v1556_v37 = vld [vmem:[%s1528_s25 + $0x28] sm:$0xff]  ;;  %p1262_p12 = pnand %p1261_p11, %p1420_p5  ;;  %p1267_p2 = por %p1266_p1, %p1265_p0 }
  0x21   : > { %559 = vmatpush.msra.mxu1 %v507_v11  ;;  %v1537_v32 = vld [vmem:[%s1528_s25] sm:$0xff]  ;;  %v1561_v38 = vld [vmem:[%s1528_s25 + $0x30] sm:$0xff]  ;;  %v1564_v39 = vld [vmem:[%s1528_s25 + $0x38] sm:$0xff] }
  0x22   : > { %519 = vmatpush.msra.mxu0 %v490_v12  ;;  %v1553_v36 = vld [vmem:[%s1528_s25 + $0x20] sm:$0xff]  ;;  %v1572_v41 = vld [vmem:[%s1528_s25 + $0x48] sm:$0xff]  ;;  %v1577_v42 = vld [vmem:[%s1528_s25 + $0x50] sm:$0xff]  ;;  %p1263_p13 = pneg %p1262_p12 }
  0x23   : > { %560 = vmatpush.msra.mxu1 %v506_v13  ;;  %v1569_v40 = vld [vmem:[%s1528_s25 + $0x40] sm:$0xff]  ;;  %v1580_v43 = vld [vmem:[%s1528_s25 + $0x58] sm:$0xff]  ;;  %v1588_v45 = vld [vmem:[%s1528_s25 + $0x68] sm:$0xff] }
  0x24   : > { %520 = vmatpush.msra.mxu0 %v489_v14  ;;  %v1585_v44 = vld [vmem:[%s1528_s25 + $0x60] sm:$0xff]  ;;  %v1593_v46 = vld [vmem:[%s1528_s25 + $0x70] sm:$0xff]  ;;  %v1596_v47 = vld [vmem:[%s1528_s25 + $0x78] sm:$0xff]  ;;  %s1128_s25 = sshll.u32 %s439_s16, 5  ;;  %p1268_p3 = pnand %p1267_p2, %p1263_p13 }
  0x25   : > { %561 = vmatpush.msra.mxu1 %v505_v15  ;;  %v1183_v12 = vld [vmem:[%s1858_s3] sm:$0xff]  ;;  %v1184_v13 = vld [vmem:[%s1858_s3 + $0x8] sm:$0xff]  ;;  %v729_v15 = vld [vmem:[%s1857_s2 + $0xf8] sm:$0xff] }
  0x26   : > { %521 = vmatpush.msra.mxu0 %v488_v16  ;;  %v728_v16 = vld [vmem:[%s1857_s2 + $0xf0] sm:$0xff] }
  0x27   : > { %562 = vmatpush.msra.mxu1 %v504_v17 }
  0x28   : > { %522 = vmatpush.msra.mxu0 %v487_v18  ;;  %v727_v18 = vld [vmem:[%s1857_s2 + $0xe8] sm:$0xff] }
  0x29   : > { %563 = vmatpush.msra.mxu1 %v503_v19  ;;  %v726_v19 = vld [vmem:[%s1857_s2 + $0xe0] sm:$0xff] }
  0x2a   : > { %523 = vmatpush.msra.mxu0 %v486_v20  ;;  %v725_v20 = vld [vmem:[%s1857_s2 + $0xd8] sm:$0xff] }
  0x2b   : > { %564 = vmatpush.msra.mxu1 %v502_v21  ;;  %v724_v21 = vld [vmem:[%s1857_s2 + $0xd0] sm:$0xff] }
  0x2c   : > { %524 = vmatpush.msra.mxu0 %v485_v22 }
  0x2d   : > { %565 = vmatpush.msra.mxu1 %v501_v23  ;;  %v723_v23 = vld [vmem:[%s1857_s2 + $0xc8] sm:$0xff] }
  0x2e   : > { %525 = vmatpush.msra.mxu0 %v484_v24  ;;  %v722_v24 = vld [vmem:[%s1857_s2 + $0xc0] sm:$0xff] }
  0x2f   : > { %566 = vmatpush.msra.mxu1 %v500_v25  ;;  %v605_v25 = vld [vmem:[%s1859_s4 + $0x10] sm:$0xff] }
  0x30   : > { %526 = vmatpush.msra.mxu0 %v483_v26  ;;  %v604_v26 = vld [vmem:[%s1859_s4 + $0x8] sm:$0xff] }
  0x31   : > { %567 = vmatpush.msra.mxu1 %v499_v27  ;;  %v606_v27 = vld [vmem:[%s1859_s4 + $0x18] sm:$0xff] }
  0x32   : > { %527 = vmatpush.msra.mxu0 %v482_v28  ;;  %v721_v28 = vld [vmem:[%s1857_s2 + $0xb8] sm:$0xff] }
  0x33   : > { %568 = vmatpush.msra.mxu1 %v498_v29 }
  0x34   : > { %528 = vmatpush.msra.mxu0 %v481_v30  ;;  %v720_v30 = vld [vmem:[%s1857_s2 + $0xb0] sm:$0xff] }
  0x35   : > { %569 = vmatpush.msra.mxu1 %v497_v31  ;;  %529 = vmatmul.f32.vlgmr.msra.gmra.mxu0 %v1537_v32  ;;  %v603_v31 = vld [vmem:[%s1859_s4] sm:$0xff] }
  0x36   : > { %570 = vmatmul.f32.vlgmr.msra.gmra.mxu1 %v1540_v33 }
  0x3d   : > { %532 = vmatmul.f32.gmra.mxu0 %v1545_v34 }
  0x3e   : > { %573 = vmatmul.f32.gmra.mxu1 %v1548_v35 }
  0x45   : > { %535 = vmatmul.f32.gmra.mxu0 %v1553_v36 }
  0x46   : > { %576 = vmatmul.f32.gmra.mxu1 %v1556_v37 }
  0x4d   : > { %538 = vmatmul.f32.gmra.mxu0 %v1561_v38 }
  0x4e   : > { %579 = vmatmul.f32.gmra.mxu1 %v1564_v39 }
  0x55   : > { %541 = vmatmul.f32.gmra.mxu0 %v1569_v40 }
  0x56   : > { %582 = vmatmul.f32.gmra.mxu1 %v1572_v41 }
  0x5d   : > { %544 = vmatmul.f32.gmra.mxu0 %v1577_v42 }
  0x5e   : > { %585 = vmatmul.f32.gmra.mxu1 %v1580_v43 }
  0x65   : > { %547 = vmatmul.f32.gmra.mxu0 %v1585_v44 }
  0x66   : > { %588 = vmatmul.f32.gmra.mxu1 %v1588_v45 }
  0x6d   : > { %550 = vmatmul.f32.gmra.mxu0 %v1593_v46 }
  0x6e   : > { %591 = vmatmul.f32.gmra.mxu1 %v1596_v47 }
  0xb2   : > { %v530_v48 = vpop.f32.mrf.mxu0 }
  0xb3   : > { %v571_v49 = vpop.f32.mrf.mxu1 }
  0xb4   : > { %v572_v50 = vadd.f32 %v571_v49, %v530_v48 }
  0xba   : > { %v533_v51 = vpop.f32.mrf.mxu0 }
  0xbb   : > { %v574_v52 = vpop.f32.mrf.mxu1 }
  0xbc   : > { %v575_v9 = vadd.f32 %v574_v52, %v533_v51  ;;  %v719_v51 = vld [vmem:[%s1857_s2 + $0xa8] sm:$0xff] }
  0xbe   : > { %v599_v11 = vpack.c.bf16 %v575_v9, %v572_v50  ;;  %v705_v9 = vld [vmem:[%s1857_s2 + $0x38] sm:$0xff] }
  0xc2   : > { %v536_v53 = vpop.f32.mrf.mxu0 }
  0xc3   : > { %v577_v54 = vpop.f32.mrf.mxu1 }
  0xc4   : > { %v578_v8 = vadd.f32 %v577_v54, %v536_v53 }
  0xca   : > { %v539_v55 = vpop.f32.mrf.mxu0 }
  0xcb   : > { %v580_v56 = vpop.f32.mrf.mxu1 }
  0xcc   : > { %v581_v6 = vadd.f32 %v580_v56, %v539_v55  ;;  %v718_v55 = vld [vmem:[%s1857_s2 + $0xa0] sm:$0xff] }
  0xce   : > { %v600_v10 = vpack.c.bf16 %v581_v6, %v578_v8  ;;  %v708_v6 = vld [vmem:[%s1857_s2 + $0x50] sm:$0xff]  ;;  %v1186_v8 = vld [vmem:[%s1860_s5 + $0x8] sm:$0xff] }
  0xd2   : > { %v542_v57 = vpop.f32.mrf.mxu0 }
  0xd3   : > { %v583_v58 = vpop.f32.mrf.mxu1 }
  0xd4   : > { %v584_v5 = vadd.f32 %v583_v58, %v542_v57  ;;  %v717_v58 = vld [vmem:[%s1857_s2 + $0x98] sm:$0xff] }
  0xda   : > { %v545_v59 = vpop.f32.mrf.mxu0 }
  0xdb   : > { %v586_v60 = vpop.f32.mrf.mxu1 }
  0xdc   : > { %v587_v3 = vadd.f32 %v586_v60, %v545_v59  ;;  %v716_v60 = vld [vmem:[%s1857_s2 + $0x90] sm:$0xff] }
  0xde   : > { %v601_v7 = vpack.c.bf16 %v587_v3, %v584_v5  ;;  %v711_v3 = vld [vmem:[%s1857_s2 + $0x68] sm:$0xff]  ;;  %v709_v5 = vld [vmem:[%s1857_s2 + $0x58] sm:$0xff] }
  0xe2   : > { %v548_v61 = vpop.f32.mrf.mxu0 }
  0xe3   : > { %v589_v62 = vpop.f32.mrf.mxu1 }
  0xe4   : > { %v590_v1 = vadd.f32 %v589_v62, %v548_v61  ;;  %v713_v62 = vld [vmem:[%s1857_s2 + $0x78] sm:$0xff] }
  0xea   : > { %v551_v63 = vpop.f32.mrf.mxu0 }
  0xeb   : > { %v592_v0 = vpop.f32.mrf.mxu1 }
  0xec   : > { %v593_v2 = vadd.f32 %v592_v0, %v551_v63  ;;  %v715_v63 = vld [vmem:[%s1857_s2 + $0x88] sm:$0xff]  ;;  %v1185_v0 = vld [vmem:[%s1860_s5] sm:$0xff] }
  0xee   : > { %v602_v4 = vpack.c.bf16 %v593_v2, %v590_v1  ;;  %v714_v1 = vld [vmem:[%s1857_s2 + $0x80] sm:$0xff]  ;;  %v712_v2 = vld [vmem:[%s1857_s2 + $0x70] sm:$0xff] }
  0xf0   : > { %628 = vmatpush.bf16.msra.mxu2 %v602_v4  ;;  %v710_v4 = vld [vmem:[%s1857_s2 + $0x60] sm:$0xff] }
  0xf4   : > { %629 = vmatpush.bf16.msra.mxu2 %v601_v7  ;;  %v706_v7 = vld [vmem:[%s1857_s2 + $0x40] sm:$0xff] }
  0xf8   : > { %630 = vmatpush.bf16.msra.mxu2 %v600_v10  ;;  %v704_v10 = vld [vmem:[%s1857_s2 + $0x30] sm:$0xff] }
  0xfc   : > { %631 = vmatpush.bf16.msra.mxu2 %v599_v11  ;;  %v702_v11 = vld [vmem:[%s1857_s2 + $0x20] sm:$0xff] }
  0xff   : > { %1143 = vmatmul.msk.bf16.vlgmr.msra.gmra.mxu2 %vm617_vm0, %v1183_v12  ;;  %v701_v12 = vld [vmem:[%s1857_s2 + $0x18] sm:$0xff] }
 0x100   : > { %771 = vmatpush.msrb.mxu2 %v729_v15 }
 0x102   : > { %772 = vmatpush.msrb.mxu2 %v728_v16 }
 0x104   : > { %773 = vmatpush.msrb.mxu2 %v727_v18 }
 0x106   : > { %774 = vmatpush.msrb.mxu2 %v726_v19 }
 0x108   : > { %775 = vmatpush.msrb.mxu2 %v725_v20 }
 0x10a   : > { %776 = vmatpush.msrb.mxu2 %v724_v21 }
 0x10c   : > { %777 = vmatpush.msrb.mxu2 %v723_v23 }
 0x10e   : > { %778 = vmatpush.msrb.mxu2 %v722_v24 }
 0x10f   : > { %1144 = vmatmul.msk.bf16.gmra.mxu2 %vm617_vm0, %v1184_v13  ;;  %v700_v13 = vld [vmem:[%s1857_s2 + $0x10] sm:$0xff] }
 0x110   : > { %779 = vmatpush.msrb.mxu2 %v721_v28 }
 0x112   : > { %780 = vmatpush.msrb.mxu2 %v720_v30  ;;  %v820_v30 = vld [vmem:[%s1863_s8] sm:$0xff] }
 0x114   : > { %781 = vmatpush.msrb.mxu2 %v719_v51 }
 0x116   : > { %782 = vmatpush.msrb.mxu2 %v718_v55 }
 0x118   : > { %783 = vmatpush.msrb.mxu2 %v717_v58 }
 0x11a   : > { %784 = vmatpush.msrb.mxu2 %v716_v60 }
 0x11c   : > { %785 = vmatpush.msrb.mxu2 %v715_v63 }
 0x11e   : > { %786 = vmatpush.msrb.mxu2 %v714_v1  ;;  %v1188_v1 = vld [vmem:[%s1862_s7 + $0x8] sm:$0xff] }
 0x11f   : > { %787 = vmatmul.f32.vlgmr.msrb.gmra.mxu2 %v1540_v33  ;;  %v707_v33 = vld [vmem:[%s1857_s2 + $0x48] sm:$0xff] }
 0x127   : > { %790 = vmatmul.f32.gmra.mxu2 %v1548_v35  ;;  %v703_v35 = vld [vmem:[%s1857_s2 + $0x28] sm:$0xff] }
 0x12f   : > { %793 = vmatmul.f32.gmra.mxu2 %v1556_v37  ;;  %v699_v37 = vld [vmem:[%s1857_s2 + $0x8] sm:$0xff] }
 0x137   : > { %796 = vmatmul.f32.gmra.mxu2 %v1564_v39 }
 0x13f   : > { %799 = vmatmul.f32.gmra.mxu2 %v1572_v41  ;;  %v655_v41 = vld [vmem:[%s1861_s6 + $0x10] sm:$0xff] }
 0x147   : > { %802 = vmatmul.f32.gmra.mxu2 %v1580_v43 }
 0x14f   : > { %805 = vmatmul.f32.gmra.mxu2 %v1588_v45  ;;  %v656_v45 = vld [vmem:[%s1861_s6 + $0x18] sm:$0xff] }
 0x157   : > { %808 = vmatmul.f32.gmra.mxu2 %v1596_v47 }
 0x182   : > { %v633_v14 = vpop.f32.mrf.mxu2 }
 0x183   : > { %v634_v52 = vadd.f32 %v633_v14, %v603_v31  ;;  %v698_v14 = vld [vmem:[%s1857_s2] sm:$0xff] }
 0x185   : > { %v643_v59 = vmax.f32 %v634_v52, 0.0 }
 0x18a   : > { %v635_v17 = vpop.f32.mrf.mxu2 }
 0x18b   : > { %v636_v49 = vadd.f32 %v635_v17, %v604_v26 }
 0x18d   : > { %v644_v56 = vmax.f32 %v636_v49, 0.0  ;;  %v821_v49 = vld [vmem:[%s1863_s8 + $0x8] sm:$0xff] }
 0x18f   : > { %v651_v61 = vpack.c.bf16 %v644_v56, %v643_v59  ;;  %v891_v56 = vld [vmem:[%s1865_s10 + $0x10] sm:$0xff] }
 0x192   : > { %v638_v22 = vpop.f32.mrf.mxu2 }
 0x193   : > { %v639_v29 = vadd.f32 %v638_v22, %v605_v25 }
 0x195   : > { %v645_v53 = vmax.f32 %v639_v29, 0.0  ;;  %v822_v29 = vld [vmem:[%s1863_s8 + $0x10] sm:$0xff] }
 0x19a   : > { %v640_v48 = vpop.f32.mrf.mxu2 }
 0x19b   : > { %v641_v50 = vadd.f32 %v640_v48, %v606_v27  ;;  %v1308_v27 = vmov 0   ;;  %v823_v48 = vld [vmem:[%s1863_s8 + $0x18] sm:$0xff] }
 0x19c   : > { %1239 = vset.pattern.permute.xlu0 %v1308_v27  ;;  %1240 = vset.pattern.permute.xlu1 %v1308_v27 }
 0x19d   : > { %v646_v54 = vmax.f32 %v641_v50, 0.0  ;;  %1241 = vset.pattern.permute.xlu2 %v1308_v27  ;;  %836 = vperm.xlu0 %1239, %v822_v29  }
 0x19e   : > { %826 = vperm.xlu1 %1240, %v820_v30  }
 0x19f   : > { %v652_v57 = vpack.c.bf16 %v646_v54, %v645_v53 }
 0x1a1   : > { %680 = vmatpush.bf16.msra.mxu3 %v652_v57  ;;  %v892_v57 = vld [vmem:[%s1865_s10 + $0x18] sm:$0xff] }
 0x1a2   : > { %v788_v43 = vpop.f32.mrf.mxu2 }
 0x1a5   : > { %681 = vmatpush.bf16.msra.mxu3 %v651_v61  ;;  %841 = vperm.xlu0 %1239, %v823_v48  }
 0x1a6   : > { %831 = vperm.xlu1 %1240, %v821_v49  }
 0x1a8   : > { %1153 = vmatmul.msk.bf16.vlgmr.msra.gmra.mxu3 %vm667_vm1, %v1185_v0 }
 0x1a9   : > { %730 = vmatpush.msrb.mxu3 %v713_v62 }
 0x1aa   : > { %v791_v15 = vpop.f32.mrf.mxu2 }
 0x1ab   : > { %731 = vmatpush.msrb.mxu3 %v712_v2  ;;  %v1187_v2 = vld [vmem:[%s1862_s7] sm:$0xff] }
 0x1ad   : > { %732 = vmatpush.msrb.mxu3 %v711_v3  ;;  %905 = vperm.xlu0 %1239, %v891_v56  }
 0x1ae   : > { %910 = vperm.xlu1 %1240, %v892_v57  }
 0x1af   : > { %733 = vmatpush.msrb.mxu3 %v710_v4 }
 0x1b1   : > { %734 = vmatpush.msrb.mxu3 %v709_v5 }
 0x1b2   : > { %v794_v18 = vpop.f32.mrf.mxu2 }
 0x1b3   : > { %735 = vmatpush.msrb.mxu3 %v708_v6 }
 0x1b5   : > { %736 = vmatpush.msrb.mxu3 %v707_v33 }
 0x1b7   : > { %737 = vmatpush.msrb.mxu3 %v706_v7  ;;  %v889_v7 = vld [vmem:[%s1865_s10] sm:$0xff] }
 0x1b8   : > { %1154 = vmatmul.msk.bf16.gmra.mxu3 %vm667_vm1, %v1186_v8  ;;  %895 = vperm.xlu2 %1241, %v889_v7  }
 0x1b9   : > { %738 = vmatpush.msrb.mxu3 %v705_v9 }
 0x1ba   : > { %v797_v20 = vpop.f32.mrf.mxu2 }
 0x1bb   : > { %739 = vmatpush.msrb.mxu3 %v704_v10 }
 0x1bd   : > { %740 = vmatpush.msrb.mxu3 %v703_v35 }
 0x1bf   : > { %741 = vmatpush.msrb.mxu3 %v702_v11 }
 0x1c1   : > { %742 = vmatpush.msrb.mxu3 %v701_v12 }
 0x1c2   : > { %v800_v23 = vpop.f32.mrf.mxu2 }
 0x1c3   : > { %743 = vmatpush.msrb.mxu3 %v700_v13 }
 0x1c5   : > { %744 = vmatpush.msrb.mxu3 %v699_v37 }
 0x1c7   : > { %745 = vmatpush.msrb.mxu3 %v698_v14 }
 0x1c8   : > { %746 = vmatmul.f32.vlgmr.msrb.gmra.mxu3 %v1537_v32  ;;  %v653_v32 = vld [vmem:[%s1861_s6] sm:$0xff] }
 0x1ca   : > { %v803_v25 = vpop.f32.mrf.mxu2 }
 0x1d0   : > { %749 = vmatmul.f32.gmra.mxu3 %v1545_v34 }
 0x1d2   : > { %v806_v28 = vpop.f32.mrf.mxu2 }
 0x1d8   : > { %752 = vmatmul.f32.gmra.mxu3 %v1553_v36 }
 0x1da   : > { %v809_v50 = vpop.f32.mrf.mxu2 }
 0x1e0   : > { %755 = vmatmul.f32.gmra.mxu3 %v1561_v38  ;;  %v654_v38 = vld [vmem:[%s1861_s6 + $0x8] sm:$0xff] }
 0x1e8   : > { %758 = vmatmul.f32.gmra.mxu3 %v1569_v40 }
 0x1f0   : > { %761 = vmatmul.f32.gmra.mxu3 %v1577_v42 }
 0x1f8   : > { %764 = vmatmul.f32.gmra.mxu3 %v1585_v44 }
 0x200   : > { %767 = vmatmul.f32.gmra.mxu3 %v1593_v46 }
 0x20f   : > { %v837_v4 = vpop.permute.xlu0 %836 }
 0x210   : > { %v827_v5 = vpop.permute.xlu1 %826 }
 0x217   : > { %v842_v8 = vpop.permute.xlu0 %841 }
 0x218   : > { %v832_v35 = vpop.permute.xlu1 %831 }
 0x22b   : > { %v683_v34 = vpop.f32.mrf.mxu3 }
 0x22c   : > { %v684_v36 = vadd.f32 %v683_v34, %v653_v32  ;;  %v890_v32 = vld [vmem:[%s1865_s10 + $0x8] sm:$0xff] }
 0x22d   : > { %900 = vperm.xlu2 %1241, %v890_v32  }
 0x22e   : > { %694 = vst.msk [vmem:[%s458_s19] sm:$0xff] %vm693_vm2, %v684_v36 }
 0x233   : > { %v685_v39 = vpop.f32.mrf.mxu3 }
 0x234   : > { %v686_v40 = vadd.f32 %v685_v39, %v654_v38 }
 0x236   : > { %695 = vst.msk [vmem:[%s458_s19 + $0x8] sm:$0xff] %vm693_vm2, %v686_v40  ;;  %v1189_v40 = vld [vmem:[%s1864_s9] sm:$0xff] }
 0x23b   : > { %v688_v42 = vpop.f32.mrf.mxu3 }
 0x23c   : > { %v689_v44 = vadd.f32 %v688_v42, %v655_v41  ;;  %v1190_v41 = vld [vmem:[%s1864_s9 + $0x8] sm:$0xff]  ;;  %v896_v42 = vpop.permute.xlu2 %895 }
 0x23e   : > { %696 = vst.msk [vmem:[%s458_s19 + $0x10] sm:$0xff] %vm693_vm2, %v689_v44 }
 0x243   : > { %v690_v46 = vpop.f32.mrf.mxu3 }
 0x244   : > { %v691_v47 = vadd.f32 %v690_v46, %v656_v45 }
 0x246   : > { %697 = vst.msk [vmem:[%s458_s19 + $0x18] sm:$0xff] %vm693_vm2, %v691_v47  ;;  %s441_s19 = scalar_lea.vmem [#allocation2], %s1128_s25 }
 0x247   : > { %s1006_s21 = sshll.u32 %s441_s19, 4  ;;  %s1007_s21 = int_to_ptr.vmem [resolvable:$true] %s1006_s21 }
 0x24b   : > { %v747_v16 = vpop.f32.mrf.mxu3 }
 0x24c   : > { %v789_v17 = vadd.f32 %v788_v43, %v747_v16 }
 0x253   : > { %v750_v19 = vpop.f32.mrf.mxu3 }
 0x254   : > { %v792_v62 = vadd.f32 %v791_v15, %v750_v19 }
 0x256   : > { %v816_v0 = vpack.c.bf16 %v792_v62, %v789_v17  ;;  %v906_v17 = vpop.permute.xlu0 %905 }
 0x25b   : > { %v753_v21 = vpop.f32.mrf.mxu3 }
 0x25c   : > { %v795_v61 = vadd.f32 %v794_v18, %v753_v21  ;;  %v911_v21 = vpop.permute.xlu1 %910 }
 0x263   : > { %v756_v22 = vpop.f32.mrf.mxu3 }
 0x264   : > { %v798_v59 = vadd.f32 %v797_v20, %v756_v22 }
 0x266   : > { %v817_v63 = vpack.c.bf16 %v798_v59, %v795_v61 }
 0x26b   : > { %v759_v24 = vpop.f32.mrf.mxu3 }
 0x26c   : > { %v801_v58 = vadd.f32 %v800_v23, %v759_v24 }
 0x273   : > { %v762_v26 = vpop.f32.mrf.mxu3 }
 0x274   : > { %v804_v54 = vadd.f32 %v803_v25, %v762_v26 }
 0x276   : > { %v818_v60 = vpack.c.bf16 %v804_v54, %v801_v58 }
 0x27b   : > { %v765_v31 = vpop.f32.mrf.mxu3 }
 0x27c   : > { %v807_v52 = vadd.f32 %v806_v28, %v765_v31 }
 0x283   : > { %v768_v51 = vpop.f32.mrf.mxu3 }
 0x284   : > { %v810_v53 = vadd.f32 %v809_v50, %v768_v51 }
 0x286   : > { %v819_v55 = vpack.c.bf16 %v810_v53, %v807_v52 }
 0x287   : > { %v901_v46 = vpop.permute.xlu2 %900 }
 0x288   : > { %864 = vmatpush.bf16.msrb.mxu0 %v819_v55  ;;  %1192 = vmatpush.bf16.msra.mxu3 %v819_v55 }
 0x28c   : > { %865 = vmatpush.bf16.msrb.mxu0 %v818_v60  ;;  %1193 = vmatpush.bf16.msra.mxu3 %v818_v60 }
 0x290   : > { %866 = vmatpush.bf16.msrb.mxu0 %v817_v63  ;;  %1194 = vmatpush.bf16.msra.mxu3 %v817_v63 }
 0x294   : > { %867 = vmatpush.bf16.msrb.mxu0 %v816_v0  ;;  %1195 = vmatpush.bf16.msra.mxu3 %v816_v0 }
 0x297   : > { %1164 = vmatmul.msk.bf16.vlgmr.msra.gmra.mxu3 %vm617_vm0, %v1188_v1  ;;  %1163 = vmatmul.msk.bf16.vlgmr.msrb.gmra.mxu0 %vm617_vm0, %v1187_v2 }
 0x314   : > { %v869_v3 = vpop.f32.mrf.mxu0 }
 0x315   : > { %v870_v11 = vadd.f32 %v869_v3, %v827_v5 }
 0x317   : > { %v879_v34 = vmax.f32 %v870_v11, 0.0 }
 0x31a   : > { %v874_v6 = vpop.f32.mrf.mxu3 }
 0x31b   : > { %v875_v9 = vadd.f32 %v874_v6, %v837_v4 }
 0x31c   : > { %v871_v33 = vpop.f32.mrf.mxu0 }
 0x31d   : > { %v872_v13 = vadd.f32 %v871_v33, %v832_v35  ;;  %v881_v37 = vmax.f32 %v875_v9, 0.0 }
 0x31f   : > { %v880_v36 = vmax.f32 %v872_v13, 0.0 }
 0x321   : > { %v887_v39 = vpack.c.bf16 %v880_v36, %v879_v34 }
 0x322   : > { %v876_v10 = vpop.f32.mrf.mxu3 }
 0x323   : > { %v877_v12 = vadd.f32 %v876_v10, %v842_v8 }
 0x325   : > { %v882_v14 = vmax.f32 %v877_v12, 0.0 }
 0x327   : > { %v888_v38 = vpack.c.bf16 %v882_v14, %v881_v37 }
 0x329   : > { %935 = vmatpush.bf16.msrb.mxu1 %v888_v38 }
 0x32d   : > { %936 = vmatpush.bf16.msrb.mxu1 %v887_v39 }
 0x330   : > { %1173 = vmatmul.msk.bf16.vlgmr.msrb.gmra.mxu1 %vm667_vm1, %v1189_v40 }
 0x340   : > { %1174 = vmatmul.msk.bf16.gmra.mxu1 %vm667_vm1, %v1190_v41 }
 0x3ad   : > { %v938_v43 = vpop.f32.mrf.mxu1 }
 0x3ae   : > { %v939_v44 = vadd.f32 %v938_v43, %v896_v42 }
 0x3b0   : > { %949 = vst.msk [vmem:[%s441_s19] sm:$0xff] %vm948_vm3, %v939_v44  ;;  %v953_v45 = vsel %vm948_vm3, %v939_v44, 0.0 }
 0x3b1   : > { %954 = vadd.xlane.f32.xlu2 %v953_v45 }
 0x3b5   : > { %v940_v47 = vpop.f32.mrf.mxu1 }
 0x3b6   : > { %v941_v15 = vadd.f32 %v940_v47, %v901_v46 }
 0x3b8   : > { %950 = vst.msk [vmem:[%s441_s19 + $0x8] sm:$0xff] %vm948_vm3, %v941_v15  ;;  %v956_v16 = vsel %vm948_vm3, %v941_v15, 0.0 }
 0x3b9   : > { %957 = vadd.xlane.f32.xlu0 %v956_v16 }
 0x3bd   : > { %v943_v18 = vpop.f32.mrf.mxu1 }
 0x3be   : > { %v944_v19 = vadd.f32 %v943_v18, %v906_v17 }
 0x3c0   : > { %951 = vst.msk [vmem:[%s441_s19 + $0x10] sm:$0xff] %vm948_vm3, %v944_v19  ;;  %v959_v20 = vsel %vm948_vm3, %v944_v19, 0.0 }
 0x3c1   : > { %960 = vadd.xlane.f32.xlu1 %v959_v20 }
 0x3c5   : > { %v945_v22 = vpop.f32.mrf.mxu1 }
 0x3c6   : > { %v946_v23 = vadd.f32 %v945_v22, %v911_v21 }
 0x3c8   : > { %952 = vst.msk [vmem:[%s441_s19 + $0x18] sm:$0xff] %vm948_vm3, %v946_v23  ;;  %v962_v24 = vsel %vm948_vm3, %v946_v23, 0.0 }
 0x3c9   : > { %963 = vadd.xlane.f32.xlu2 %v962_v24 }
 0x3ca   : > { %1271 = shalt.err (!%p1268_p3)
}
 0x3cb   : > { %s1309_s16 = smov 128   ;;  %s1310_s19 = smov 8   ;;  %v1311_v25 = vmov 49.0  }
 0x3cc   : > { %1196 = dma.vmem_to_hbm [thread:$0]  (%p1420_p5), %s1007_s21, 512, %s1009_s22, %s986_s29, %s1309_s16, %s1309_s16, %s1310_s19   ;;  %1242 = vrcp.f32 %v1311_v25 }
 0x3cd   : > { %s463_s25 = scalar_lea.vmem %s1868_s13, %s1181_s14 }
 0x3d2   : > { %v1243_v26 = vpop.eup %1242 }
 0x3d3   : > { %v966_v27 = vmul.f32 49.0, %v1243_v26  ;;  %vm970_vm4 = vweird.f32 %v1243_v26 }
 0x3d5   : > { %v967_v28 = vsub.f32 1.0, %v966_v27 }
 0x3d7   : > { %v968_v29 = vmul.f32 %v1243_v26, %v967_v28 }
 0x3d9   : > { %v969_v30 = vadd.f32 %v1243_v26, %v968_v29 }
 0x3db   : > { %v971_v31 = vsel %vm970_vm4, %v1243_v26, %v969_v30 }
 0x424   : > { %v955_v48 = vpop.xlane.xlu2 %954 }
 0x425   : > { %v972_v49 = vmul.f32 %v971_v31, %v955_v48 }
 0x427   : > { %976 = vst.msk [vmem:[%s463_s25] sm:$0xff] %vm693_vm2, %v972_v49 }
 0x42c   : > { %v958_v50 = vpop.xlane.xlu0 %957 }
 0x42d   : > { %v973_v51 = vmul.f32 %v971_v31, %v958_v50 }
 0x42f   : > { %977 = vst.msk [vmem:[%s463_s25 + $0x8] sm:$0xff] %vm693_vm2, %v973_v51 }
 0x434   : > { %v961_v52 = vpop.xlane.xlu1 %960 }
 0x435   : > { %v974_v53 = vmul.f32 %v971_v31, %v961_v52 }
 0x437   : > { %978 = vst.msk [vmem:[%s463_s25 + $0x10] sm:$0xff] %vm693_vm2, %v974_v53 }
 0x43c   : > { %v964_v54 = vpop.xlane.xlu2 %963 }
 0x43d   : > { %v975_v55 = vmul.f32 %v971_v31, %v964_v54 }
 0x43f   : > { %979 = vst.msk [vmem:[%s463_s25 + $0x18] sm:$0xff] %vm693_vm2, %v975_v55 }
 0x440 PF: > { %s1881_s18 = sld [smem:[#allocation5_spill]]  ;;  %p1202_p4 = scmp.ge.s32.totalorder %s1306_s28, 2 }
 0x442   : > { %p1199_p5 = pnand %p1202_p4, %p1424_p6 }
 0x444   : > { %p1200_p7 = pneg %p1199_p5 }
 0x446   : > { %s1034_s14 = sand.u32 1, %s1881_s18  }
 0x447   : > { %s1035_s21 = scalar_lea.sflag [#allocation3], %s1034_s14 }
 0x448   : > { %1289 = dma.done.wait (%p1200_p7), %s1035_s21, 512  }
 0x449   : > { %1291 = vsyncadd (%p1200_p7), %s1035_s21, 4294966784  ;;  %s1883_s28 = sld [smem:[#allocation7_spill]]  ;;  %s1886_s25 = smov %s1298_s26 }
 0x44a   : > { %s1884_s22 = sld [smem:[#allocation6_spill]] }
 0x44b   : > { %s1885_s27 = sld [smem:[#allocation8_spill]] }
 0x44f   : > { %p24_p8 = scmp.ge.s32.totalorder %s1883_s28, 4  }
 0x450   : > { %s1887_s26 = smov %s1884_s22 }
 0x451   :  { %26 = sbr.rel (!%p24_p8) target bundleno = 3 (0x3), region = 123 }
 0x456   :  { %1049 = vsyncpa [#allocation3], 1 }
 0x457   :  { %1051 = vsyncpa [#allocation3 + $0x1], 1 }

</bundles_post_ra>
